<compile_context>
chip_gen: v7x
topology: tpu7x:2x2x1
jax: 0.10.0
libtpu: 0.0.40
codegen_flags: <defaults>
</compile_context>

<pallas_src>
import jax
import jax.numpy as jnp
from jax.experimental import pallas as pl
from jax.experimental.pallas import tpu as pltpu


_LANES = 512                 # lane-dense slab width (multiple of 128)
_BLOCK_ROWS = 512            # rows per tile (multiple of 8); 512x512 f32 = 1 MiB
_MIN_PALLAS_ELEMS = 8 * 128  # below one vreg, Pallas launch overhead dominates


def _scale_kernel(w_ref, x_ref, o_ref):
    # w_ref: (1,) f32 scalar in SMEM; x_ref/o_ref: (block_rows, _LANES) VMEM.
    x = x_ref[...]
    w = w_ref[0].astype(x.dtype)         # scalar-unit read; VPU mul in native dtype
    o_ref[...] = (x * w).astype(o_ref.dtype)


def scalar_wrapper_loss(loss: jax.Array, weight: float = 1.0) -> jax.Array:
    """weight * loss (ScalarWrapperLoss.forward), Pallas-accelerated for big tensors."""
    n = loss.size
    if n < _MIN_PALLAS_ELEMS:
        # Common case: externally reduced 0-dim scalar loss (or tiny vector).
        # A single XLA multiply beats any pallas_call here.
        return weight * loss

    orig_shape = loss.shape
    flat = loss.reshape(-1)

    # Lane-dense slab: pad (only when needed) so the last dim is a large
    # multiple of 128 -> unmasked vst stores instead of vst.msk partials.
    pad = (-n) % _LANES
    if pad:
        flat = jnp.pad(flat, (0, pad))
    rows = flat.size // _LANES
    x2d = flat.reshape(rows, _LANES)

    # Block rows: multiple of 8, or the full row extent for small slabs
    # (block_shape equal to the full dim is always legal).
    block_rows = _BLOCK_ROWS if rows >= _BLOCK_ROWS else rows
    grid = (pl.cdiv(rows, block_rows),)

    w_arr = jnp.asarray([weight], dtype=jnp.float32)

    itemsize = jnp.dtype(loss.dtype).itemsize
    cost = pl.CostEstimate(
        flops=n, transcendentals=0, bytes_accessed=2 * n * itemsize)

    out2d = pl.pallas_call(
        _scale_kernel,
        out_shape=jax.ShapeDtypeStruct((rows, _LANES), loss.dtype),
        grid_spec=pl.GridSpec(
            grid=grid,
            in_specs=[
                pl.BlockSpec(memory_space=pltpu.MemorySpace.SMEM),  # weight
                pl.BlockSpec((block_rows, _LANES), lambda i: (i, 0)),
            ],
            out_specs=pl.BlockSpec((block_rows, _LANES), lambda i: (i, 0)),
        ),
        compiler_params=pltpu.CompilerParams(
            dimension_semantics=("parallel",)),
        cost_estimate=cost,
    )(w_arr, x2d)

    out_flat = out2d.reshape(-1)
    if pad:
        out_flat = out_flat[:n]
    return out_flat.reshape(orig_shape)


if __name__ == "__main__":
    key = jax.random.PRNGKey(0)
    weight = 0.5  # static module "parameter" (as in __init__)
    k1, k2, k3, k4 = jax.random.split(key, 4)

    # Case 1: the typical externally-computed 0-dim scalar loss (fast path).
    scalar_loss = jax.random.normal(k1, (), dtype=jnp.float32)
    out_s = scalar_wrapper_loss(scalar_loss, weight)
    jax.block_until_ready(out_s)
    assert jnp.allclose(out_s, weight * scalar_loss, atol=1e-6, rtol=1e-6)

    # Case 2: per-token loss map, lane-aligned (Pallas path, no padding).
    tok_loss = jax.random.normal(k2, (16, 128), dtype=jnp.float32)
    out_t = scalar_wrapper_loss(tok_loss, weight)
    jax.block_until_ready(out_t)
    assert out_t.shape == tok_loss.shape
    assert jnp.allclose(out_t, weight * tok_loss, atol=1e-6, rtol=1e-6)

    # Case 3: ragged shape exercising the pad-to-lane-dense path.
    ragged_loss = jax.random.normal(k3, (9, 130), dtype=jnp.float32)
    out_r = scalar_wrapper_loss(ragged_loss, weight)
    jax.block_until_ready(out_r)
    assert out_r.shape == ragged_loss.shape
    assert jnp.allclose(out_r, weight * ragged_loss, atol=1e-6, rtol=1e-6)

    # Case 4: bf16 loss, multiplied natively in bf16 inside the kernel.
    bf_loss = jax.random.normal(k4, (16, 128), dtype=jnp.bfloat16)
    out_b = scalar_wrapper_loss(bf_loss, weight)
    jax.block_until_ready(out_b)
    assert out_b.dtype == jnp.bfloat16
    assert jnp.allclose(out_b.astype(jnp.float32),
                        (weight * bf_loss).astype(jnp.float32),
                        atol=1e-2, rtol=1e-2)

    print("KERNEL_OK")
</pallas_src>

<mosaic_0001>
module attributes {stable_mosaic.version = 11 : i64} {
  func.func @_scale_kernel(%arg0: i32, %arg1: memref<1xf32, #tpu.memory_space<smem>>, %arg2: memref<4x512xf32, #tpu.memory_space<vmem>>, %arg3: memref<4x512xf32, #tpu.memory_space<vmem>>) attributes {dimension_semantics = [#tpu.dimension_semantics<parallel>], iteration_bounds = array<i64: 1>, scalar_prefetch = 0 : i64, scratch_operands = 0 : i64, tpu.core_type = #tpu.core_type<tc>, window_params = [{transform_indices = @transform_0, window_bounds = array<i64: 1>}, {transform_indices = @transform_1, window_bounds = array<i64: 4, 512>}, {transform_indices = @transform_2, window_bounds = array<i64: 4, 512>}]} {
    %c0 = arith.constant 0 : index
    %c0_0 = arith.constant 0 : index
    %0 = vector.load %arg2[%c0, %c0_0] : memref<4x512xf32, #tpu.memory_space<vmem>>, vector<4x512xf32>
    %c0_1 = arith.constant 0 : index
    %1 = memref.load %arg1[%c0_1] : memref<1xf32, #tpu.memory_space<smem>>
    %2 = vector.broadcast %1 : f32 to vector<4x512xf32>
    %3 = arith.mulf %0, %2 : vector<4x512xf32>
    %c0_2 = arith.constant 0 : index
    %c0_3 = arith.constant 0 : index
    %4 = vector.load %arg3[%c0_2, %c0_3] : memref<4x512xf32, #tpu.memory_space<vmem>>, vector<4x512xf32>
    tpu.vector_store %arg3[%c0_2, %c0_3], %3 {strides = array<i32>} : memref<4x512xf32, #tpu.memory_space<vmem>>, vector<4x512xf32>,
    return
  }
  func.func @transform_0(%arg0: i32) -> i32 {
    %c0_i32 = arith.constant 0 : i32
    %c0_i32_0 = arith.constant 0 : i32
    return %c0_i32 : i32
  }
  func.func @transform_1(%arg0: i32) -> (i32, i32) {
    %c0_i32 = arith.constant 0 : i32
    %c0_i32_0 = arith.constant 0 : i32
    return %arg0, %c0_i32 : i32, i32
  }
  func.func @transform_2(%arg0: i32) -> (i32, i32) {
    %c0_i32 = arith.constant 0 : i32
    %c0_i32_0 = arith.constant 0 : i32
    return %arg0, %c0_i32 : i32, i32
  }
}

</mosaic_0001>

<bundles_post_ra>
// kernel: tpu_custom_call.1
= control target key start
LH: loop header
LB: loop body
LE: loop exit
PB: predicated region body
PF: predicated region fallthrough
CT: control target
= control target key end

     0   :  { %8 = vsyncpa [#allocation4], 0  ;;  %s142_s0 = inlined_call_operand.<no memory space> [shape: f32[1], index: 0, kind: input, shape index: {}]   ;;  %s143_s1 = inlined_call_operand.hbm [shape: f32[4,512], index: 1, kind: input, shape index: {}]   ;;  %s144_s2 = inlined_call_operand.hbm [shape: f32[4,512], index: 2, kind: output, shape index: {}]  }
   0x1   :  { %9 = vsyncpa [#allocation5], 0  ;;  %s98_s9 = smov [#allocation3]   ;;  %s50_s13 = scalar_lea.hbm %s143_s1, 256 }
   0x2   :  { %s18_s10 = sshll.u32 %s98_s9, 4  ;;  %p51_p0 = scmp.ne.s32.totalorder %s143_s1, %s50_s13  ;;  %s19_s10 = int_to_ptr.vmem [resolvable:$true] %s18_s10 }
   0x3   :  { %p54_p1 = scmp.lt.u32.totalorder %s50_s13, %s143_s1 }
   0x5   :  { %p56_p2 = pnand %p54_p1, %p51_p0 }
   0x7   :  { %59 = shalt.err (!%p56_p2)
}
   0x8   :  { %s60_s18 = scalar_lea.vmem %s19_s10, 256  ;;  %p65_p4 = scmp.lt.s32.totalorder %s19_s10, %s19_s10 }
   0x9   :  { %p61_p3 = scmp.ne.s32.totalorder %s19_s10, %s60_s18  ;;  %p66_p5 = scmp.lt.s32.totalorder %s60_s18, %s60_s18 }
   0xb   :  { %p67_p6 = por %p66_p5, %p65_p4 }
   0xd   :  { %p68_p7 = pnand %p67_p6, %p61_p3 }
   0xf   :  { %71 = shalt.err (!%p68_p7)
}
  0x10   :  { %21 = dma.hbm_to_vmem [thread:$0]  %s143_s1, 256, %s19_s10, [#allocation4]  }
  0x11   :  { %94 = dma.done.wait [#allocation4], 256  }
  0x12   :  { %95 = vsyncadd [#allocation4], 4294967040  ;;  %v28_v0 = vstv %s142_s0  ;;  %s99_s23 = smov [#allocation6]   ;;  %v25_v1 = vld [vmem:[#allocation3] sm:$0xff]  ;;  %v26_v2 = vld [vmem:[#allocation3 + $0x8] sm:$0xff] }
  0x13   :  { %s39_s24 = sshll.u32 %s99_s23, 4  ;;  %v29_v3 = vmul.f32 %v28_v0, %v25_v1  ;;  %v30_v4 = vmul.f32 %v28_v0, %v26_v2  ;;  %s40_s24 = int_to_ptr.vmem [resolvable:$true] %s39_s24 }
  0x14   :  { %s72_s25 = scalar_lea.vmem %s40_s24, 256  ;;  %p77_p9 = scmp.lt.s32.totalorder %s40_s24, %s40_s24 }
  0x15   :  { %31 = vst [vmem:[#allocation6] sm:$0xff] %v29_v3  ;;  %32 = vst [vmem:[#allocation6 + $0x8] sm:$0xff] %v30_v4  ;;  %p73_p8 = scmp.ne.s32.totalorder %s40_s24, %s72_s25  ;;  %p78_p10 = scmp.lt.s32.totalorder %s72_s25, %s72_s25 }
  0x17   :  { %p79_p11 = por %p78_p10, %p77_p9 }
  0x19   :  { %p80_p12 = pnand %p79_p11, %p73_p8 }
  0x1b   :  { %83 = shalt.err (!%p80_p12)
}
  0x1c   :  { %s84_s0 = scalar_lea.hbm %s144_s2, 256 }
  0x1d   :  { %p85_p13 = scmp.ne.s32.totalorder %s144_s2, %s84_s0  ;;  %p88_p0 = scmp.lt.u32.totalorder %s84_s0, %s144_s2 }
  0x1f   :  { %p90_p1 = pnand %p88_p0, %p85_p13 }
  0x21   :  { %93 = shalt.err (!%p90_p1)
}
  0x22   :  { %42 = dma.vmem_to_hbm [thread:$0]  %s40_s24, 256, %s144_s2, [#allocation5]  }
  0x23   :  { %96 = dma.done.wait [#allocation5], 256  }
  0x24   :  { %97 = vsyncadd [#allocation5], 4294967040 }
  0x25   :  { %46 = vsyncpa [#allocation4], 1 }
  0x26   :  { %47 = vsyncpa [#allocation5], 1 }

</bundles_post_ra>
